<compile_context>
chip_gen: v5e
topology: v5e:2x2
jax: 0.10.0
libtpu: 0.0.40
codegen_flags: <defaults>
</compile_context>

<pallas_src>
import functools
import math

import jax
import jax.numpy as jnp
from jax.experimental import pallas as pl
from jax.experimental.pallas import tpu as pltpu


# ----------------------------------------------------------------------------
# Fused attention kernel (one grid step, whole problem in VMEM)
# ----------------------------------------------------------------------------

def _qkv_attention_kernel(qkv_ref, o_ref, *, num_heads, head_dim, scale):
    """qkv_ref: (B, S, 3*H*D) channel-last, packed as (three, head, head_dim)
       o_ref:   (B, S, H*D)   channel-last, packed as (head, head_dim)."""
    qkv = qkv_ref[...].astype(jnp.float32)            # (B, S, 3C)
    C = num_heads * head_dim
    q = qkv[:, :, 0 * C:1 * C]                        # (B, S, C)
    k = qkv[:, :, 1 * C:2 * C]
    v = qkv[:, :, 2 * C:3 * C]

    head_outs = []
    for h in range(num_heads):                        # static unroll (H small)
        lo = h * head_dim
        hi = lo + head_dim
        qh = q[:, :, lo:hi] * scale                   # (B, S, D)
        kh = k[:, :, lo:hi]
        vh = v[:, :, lo:hi]

        # batched QK^T over all batch elements in one MXU call
        s = jnp.einsum("bqd,bkd->bqk", qh, kh,
                       preferred_element_type=jnp.float32)       # (B, S, S)
        s = s - jnp.max(s, axis=-1, keepdims=True)
        e = jnp.exp(s)
        inv = pl.reciprocal(jnp.sum(e, axis=-1, keepdims=True), approx=True)
        w = e * inv                                              # softmax

        head_outs.append(
            jnp.einsum("bqk,bkd->bqd", w, vh,
                       preferred_element_type=jnp.float32))      # (B, S, D)

    # single lane-dense store of the full (B, S, H*D) output
    o_ref[...] = jnp.concatenate(head_outs, axis=-1).astype(o_ref.dtype)


# ----------------------------------------------------------------------------
# Wrapper (matches QKVFlashAttention.forward signature / layout)
# ----------------------------------------------------------------------------

def qkv_flash_attention(qkv, *, num_heads):
    """qkv: [B, 3*H*D, S] ('b (three h d) s') -> [B, H*D, S] ('b (h d) s')."""
    B, C3, S = qkv.shape
    assert C3 % (3 * num_heads) == 0
    C = C3 // 3
    head_dim = C // num_heads
    assert head_dim in (16, 32, 64), "Only head_dim in {16, 32, 64} supported"
    scale = 1.0 / math.sqrt(head_dim)

    # NCL -> NLC so channels sit on the 128-wide lane axis (lane-dense DMA).
    qkv_nlc = jnp.transpose(qkv, (0, 2, 1))           # (B, S, 3C)

    kern = functools.partial(_qkv_attention_kernel,
                             num_heads=num_heads,
                             head_dim=head_dim,
                             scale=scale)

    out_nlc = pl.pallas_call(
        kern,
        out_shape=jax.ShapeDtypeStruct((B, S, C), qkv.dtype),
        grid=(1,),                                     # whole problem = 1 block
        in_specs=[pl.BlockSpec((B, S, C3), lambda i: (0, 0, 0))],
        out_specs=pl.BlockSpec((B, S, C), lambda i: (0, 0, 0)),
        compiler_params=pltpu.CompilerParams(
            dimension_semantics=("arbitrary",)),
    )(qkv_nlc)

    return jnp.transpose(out_nlc, (0, 2, 1))           # back to [B, H*D, S]


# ----------------------------------------------------------------------------
# Pure-JAX reference (mirrors the einops rearranges + FlashAttention math)
# ----------------------------------------------------------------------------

def _reference(qkv, num_heads):
    B, C3, S = qkv.shape
    C = C3 // 3
    D = C // num_heads
    x = qkv.reshape(B, 3, num_heads, D, S)             # 'b (three h d) s'
    q = jnp.transpose(x[:, 0], (0, 1, 3, 2))           # (B, H, S, D)
    k = jnp.transpose(x[:, 1], (0, 1, 3, 2))
    v = jnp.transpose(x[:, 2], (0, 1, 3, 2))
    s = jnp.einsum("bhqd,bhkd->bhqk", q, k) / math.sqrt(D)
    w = jax.nn.softmax(s, axis=-1)
    o = jnp.einsum("bhqk,bhkd->bhqd", w, v)             # (B, H, S, D)
    return jnp.transpose(o, (0, 1, 3, 2)).reshape(B, C, S)   # 'b (h d) s'


# ----------------------------------------------------------------------------
# Main
# ----------------------------------------------------------------------------

if __name__ == "__main__":
    B, H, D, S = 2, 2, 64, 16           # embed_dim = H*D = 128 (lane-dense)
    embed_dim = H * D

    key = jax.random.PRNGKey(0)
    qkv = jax.random.normal(key, (B, 3 * embed_dim, S), dtype=jnp.float32)

    fwd = jax.jit(functools.partial(qkv_flash_attention, num_heads=H))
    out = jax.block_until_ready(fwd(qkv))

    assert out.shape == (B, embed_dim, S), out.shape
    assert bool(jnp.all(jnp.isfinite(out)))

    ref = _reference(qkv, H)
    max_err = float(jnp.max(jnp.abs(out - ref)))
    assert max_err < 1e-2, f"max abs err vs reference: {max_err}"

    print("KERNEL_OK")
</pallas_src>

<mosaic_0001>
module attributes {stable_mosaic.version = 11 : i64} {
  func.func @_qkv_attention_kernel(%arg0: i32, %arg1: memref<2x16x384xf32, #tpu.memory_space<vmem>>, %arg2: memref<2x16x128xf32, #tpu.memory_space<vmem>>) attributes {dimension_semantics = [#tpu.dimension_semantics<arbitrary>], iteration_bounds = array<i64: 1>, scalar_prefetch = 0 : i64, scratch_operands = 0 : i64, tpu.core_type = #tpu.core_type<tc>, window_params = [{pipeline_mode = #tpu.pipeline_mode<synchronous>, transform_indices = @transform_0, window_bounds = array<i64: 2, 16, 384>}, {pipeline_mode = #tpu.pipeline_mode<synchronous>, transform_indices = @transform_1, window_bounds = array<i64: 2, 16, 128>}]} {
    %c0 = arith.constant 0 : index
    %c0_0 = arith.constant 0 : index
    %c0_1 = arith.constant 0 : index
    %0 = vector.load %arg1[%c0, %c0_0, %c0_1] : memref<2x16x384xf32, #tpu.memory_space<vmem>>, vector<2x16x384xf32>
    %1 = vector.extract_strided_slice %0 {offsets = [0, 0, 0], sizes = [2, 16, 128], strides = [1, 1, 1]} : vector<2x16x384xf32> to vector<2x16x128xf32>
    %2 = vector.extract_strided_slice %0 {offsets = [0, 0, 128], sizes = [2, 16, 128], strides = [1, 1, 1]} : vector<2x16x384xf32> to vector<2x16x128xf32>
    %3 = vector.extract_strided_slice %0 {offsets = [0, 0, 256], sizes = [2, 16, 128], strides = [1, 1, 1]} : vector<2x16x384xf32> to vector<2x16x128xf32>
    %4 = vector.extract_strided_slice %1 {offsets = [0, 0, 0], sizes = [2, 16, 64], strides = [1, 1, 1]} : vector<2x16x128xf32> to vector<2x16x64xf32>
    %cst = arith.constant 1.250000e-01 : f32
    %5 = vector.broadcast %cst : f32 to vector<2x16x64xf32>
    %6 = arith.mulf %4, %5 : vector<2x16x64xf32>
    %7 = vector.extract_strided_slice %2 {offsets = [0, 0, 0], sizes = [2, 16, 64], strides = [1, 1, 1]} : vector<2x16x128xf32> to vector<2x16x64xf32>
    %8 = vector.extract_strided_slice %3 {offsets = [0, 0, 0], sizes = [2, 16, 64], strides = [1, 1, 1]} : vector<2x16x128xf32> to vector<2x16x64xf32>
    "tpu.trace_start"() <{level = 10 : i32, message = "bqd,bkd->bqk"}> : () -> ()
    %cst_2 = arith.constant dense<0.000000e+00> : vector<2x16x16xf32>
    %9 = tpu.matmul %6, %7, %cst_2 {dimension_numbers = #tpu.dot_dimension_numbers<[2], [2], [1], [1], [0, 0, 0, 1, 1, 1], [0], [0]>} : vector<2x16x64xf32>, vector<2x16x64xf32>, vector<2x16x16xf32> -> vector<2x16x16xf32>
    "tpu.trace_stop"() : () -> ()
    %cst_3 = arith.constant dense<0xFF800000> : vector<2x16xf32>
    %10 = vector.multi_reduction <maximumf>, %9, %cst_3 [2] : vector<2x16x16xf32> to vector<2x16xf32>
    %11 = vector.shape_cast %10 : vector<2x16xf32> to vector<2x16x1xf32>
    %12 = vector.broadcast %11 : vector<2x16x1xf32> to vector<2x16x16xf32>
    %13 = arith.subf %9, %12 : vector<2x16x16xf32>
    %14 = math.exp %13 : vector<2x16x16xf32>
    %cst_4 = arith.constant dense<0.000000e+00> : vector<2x16xf32>
    %15 = vector.multi_reduction <add>, %14, %cst_4 [2] : vector<2x16x16xf32> to vector<2x16xf32>
    %16 = vector.shape_cast %15 : vector<2x16xf32> to vector<2x16x1xf32>
    %17 = tpu.reciprocal %16 {approx = true} : vector<2x16x1xf32> -> vector<2x16x1xf32>
    %18 = vector.broadcast %17 : vector<2x16x1xf32> to vector<2x16x16xf32>
    %19 = arith.mulf %14, %18 : vector<2x16x16xf32>
    "tpu.trace_start"() <{level = 10 : i32, message = "bqk,bkd->bqd"}> : () -> ()
    %cst_5 = arith.constant dense<0.000000e+00> : vector<2x16x64xf32>
    %20 = tpu.matmul %19, %8, %cst_5 {dimension_numbers = #tpu.dot_dimension_numbers<[2], [1], [1], [2], [0, 0, 0, 1, 1, 2], [0], [0]>} : vector<2x16x16xf32>, vector<2x16x64xf32>, vector<2x16x64xf32> -> vector<2x16x64xf32>
    "tpu.trace_stop"() : () -> ()
    %21 = vector.extract_strided_slice %1 {offsets = [0, 0, 64], sizes = [2, 16, 64], strides = [1, 1, 1]} : vector<2x16x128xf32> to vector<2x16x64xf32>
    %cst_6 = arith.constant 1.250000e-01 : f32
    %22 = vector.broadcast %cst_6 : f32 to vector<2x16x64xf32>
    %23 = arith.mulf %21, %22 : vector<2x16x64xf32>
    %24 = vector.extract_strided_slice %2 {offsets = [0, 0, 64], sizes = [2, 16, 64], strides = [1, 1, 1]} : vector<2x16x128xf32> to vector<2x16x64xf32>
    %25 = vector.extract_strided_slice %3 {offsets = [0, 0, 64], sizes = [2, 16, 64], strides = [1, 1, 1]} : vector<2x16x128xf32> to vector<2x16x64xf32>
    "tpu.trace_start"() <{level = 10 : i32, message = "bqd,bkd->bqk"}> : () -> ()
    %cst_7 = arith.constant dense<0.000000e+00> : vector<2x16x16xf32>
    %26 = tpu.matmul %23, %24, %cst_7 {dimension_numbers = #tpu.dot_dimension_numbers<[2], [2], [1], [1], [0, 0, 0, 1, 1, 1], [0], [0]>} : vector<2x16x64xf32>, vector<2x16x64xf32>, vector<2x16x16xf32> -> vector<2x16x16xf32>
    "tpu.trace_stop"() : () -> ()
    %cst_8 = arith.constant dense<0xFF800000> : vector<2x16xf32>
    %27 = vector.multi_reduction <maximumf>, %26, %cst_8 [2] : vector<2x16x16xf32> to vector<2x16xf32>
    %28 = vector.shape_cast %27 : vector<2x16xf32> to vector<2x16x1xf32>
    %29 = vector.broadcast %28 : vector<2x16x1xf32> to vector<2x16x16xf32>
    %30 = arith.subf %26, %29 : vector<2x16x16xf32>
    %31 = math.exp %30 : vector<2x16x16xf32>
    %cst_9 = arith.constant dense<0.000000e+00> : vector<2x16xf32>
    %32 = vector.multi_reduction <add>, %31, %cst_9 [2] : vector<2x16x16xf32> to vector<2x16xf32>
    %33 = vector.shape_cast %32 : vector<2x16xf32> to vector<2x16x1xf32>
    %34 = tpu.reciprocal %33 {approx = true} : vector<2x16x1xf32> -> vector<2x16x1xf32>
    %35 = vector.broadcast %34 : vector<2x16x1xf32> to vector<2x16x16xf32>
    %36 = arith.mulf %31, %35 : vector<2x16x16xf32>
    "tpu.trace_start"() <{level = 10 : i32, message = "bqk,bkd->bqd"}> : () -> ()
    %cst_10 = arith.constant dense<0.000000e+00> : vector<2x16x64xf32>
    %37 = tpu.matmul %36, %25, %cst_10 {dimension_numbers = #tpu.dot_dimension_numbers<[2], [1], [1], [2], [0, 0, 0, 1, 1, 2], [0], [0]>} : vector<2x16x16xf32>, vector<2x16x64xf32>, vector<2x16x64xf32> -> vector<2x16x64xf32>
    "tpu.trace_stop"() : () -> ()
    %38 = tpu.concatenate %20, %37 in 2 : vector<2x16x64xf32>, vector<2x16x64xf32> -> vector<2x16x128xf32>
    %c0_11 = arith.constant 0 : index
    %c0_12 = arith.constant 0 : index
    %c0_13 = arith.constant 0 : index
    %39 = vector.load %arg2[%c0_11, %c0_12, %c0_13] : memref<2x16x128xf32, #tpu.memory_space<vmem>>, vector<2x16x128xf32>
    tpu.vector_store %arg2[%c0_11, %c0_12, %c0_13], %38 {strides = array<i32>} : memref<2x16x128xf32, #tpu.memory_space<vmem>>, vector<2x16x128xf32>,
    return
  }
  func.func @transform_0(%arg0: i32) -> (i32, i32, i32) {
    %c0_i32 = arith.constant 0 : i32
    %c0_i32_0 = arith.constant 0 : i32
    %c0_i32_1 = arith.constant 0 : i32
    %c0_i32_2 = arith.constant 0 : i32
    return %c0_i32, %c0_i32_0, %c0_i32_1 : i32, i32, i32
  }
  func.func @transform_1(%arg0: i32) -> (i32, i32, i32) {
    %c0_i32 = arith.constant 0 : i32
    %c0_i32_0 = arith.constant 0 : i32
    %c0_i32_1 = arith.constant 0 : i32
    %c0_i32_2 = arith.constant 0 : i32
    return %c0_i32, %c0_i32_0, %c0_i32_1 : i32, i32, i32
  }
}

</mosaic_0001>

<bundles_post_ra>
// kernel: qkv_flash_attention.1
= control target key start
LH: loop header
LB: loop body
LE: loop exit
PB: predicated region body
PF: predicated region fallthrough
CT: control target
= control target key end

     0   :  { %6 = vsyncpa [#allocation3], 0  ;;  %s692_s0 = inlined_call_operand.hbm [shape: f32[2,16,384], index: 0, kind: input, shape index: {}]   ;;  %s693_s1 = inlined_call_operand.hbm [shape: f32[2,16,128], index: 1, kind: output, shape index: {}]  }
   0x1   :  { %7 = vsyncpa [#allocation4], 0  ;;  %s12_s8 = sshll.u32 %s692_s0, 4  ;;  %s579_s9 = smov [#allocation2]   ;;  %s13_s8 = int_to_ptr.hbm [resolvable:$true] %s12_s8 }
   0x2   :  { %s14_s10 = sshll.u32 %s579_s9, 4  ;;  %s580_s11 = smov 384   ;;  %s15_s10 = int_to_ptr.vmem [resolvable:$true] %s14_s10 }
   0x3   :  { %s581_s12 = smov 24  }
   0x4   :  { %20 = dma.hbm_to_vmem [thread:$0]  %s13_s8, 1536, %s15_s10, [#allocation3], %s580_s11, %s580_s11, %s581_s12  }
   0x5   :  { %575 = dma.done.wait [#allocation3], 1536  }
   0x6   :  { %576 = vsyncadd [#allocation3], 4294965760  ;;  %vm41_vm0 = vcmask 523264   ;;  %v29_v0 = vld [vmem:[#allocation2 + $0x20] sm:$0xff]  ;;  %v35_v2 = vld [vmem:[#allocation2 + $0x50] sm:$0xff]  ;;  %s582_s13 = smov 64  }
   0x7   :  { %454 = vmatpush.xpose.msk.msra.mxu0 %vm41_vm0, %v29_v0  ;;  %v25_v1 = vld [vmem:[#allocation2] sm:$0xff]  ;;  %221 = vrot.lane.b32.xlu2 %v29_v0, %s582_s13  ;;  %v26_v3 = vld [vmem:[#allocation2 + $0x8] sm:$0xff]  ;;  %v31_v4 = vld [vmem:[#allocation2 + $0x30] sm:$0xff]  ;;  %vm112_vm1 = vcmask 130048   ;;  %s583_s0 = smov [#allocation5]   ;;  %s441_s17 = sshll.u32 %s693_s1, 4  ;;  %s442_s17 = int_to_ptr.hbm [resolvable:$true] %s441_s17 }
   0x8   :  { %458 = vmatpush.xpose.msk.msra.mxu1 %vm41_vm0, %v35_v2  ;;  %260 = vrot.lane.b32.xlu0 %v35_v2, %s582_s13  ;;  %v32_v5 = vld [vmem:[#allocation2 + $0x38] sm:$0xff]  ;;  %v37_v6 = vmul.f32 0.125, %v25_v1  ;;  %v604_v7 = vmul.f32 0.125, %v31_v4  ;;  %v34_v9 = vld [vmem:[#allocation2 + $0x48] sm:$0xff]  ;;  %v618_v13 = vld [vmem:[#allocation2 + $0x40] sm:$0xff]  ;;  %s439_s14 = sshll.u32 %s583_s0, 4  ;;  %s440_s14 = int_to_ptr.vmem [resolvable:$true] %s439_s14 }
   0x9   :  { %v28_v8 = vld [vmem:[#allocation2 + $0x18] sm:$0xff]  ;;  %v40_v11 = vmul.f32 0.125, %v34_v9  ;;  %v30_v41 = vld [vmem:[#allocation2 + $0x28] sm:$0xff]  ;;  %v632_v43 = vld [vmem:[#allocation2 + $0x10] sm:$0xff]  ;;  %s584_s18 = smov 128   ;;  %s585_s19 = smov 8  }
   0xa   :  { %v611_v10 = vmul.f32 0.125, %v28_v8  ;;  %v616_v12 = vld [vmem:[#allocation2 + $0x58] sm:$0xff]  ;;  %177 = vmatpush.msra.mxu2 %v30_v41 }
   0xb   :  { %455 = vmatpush.xpose.msk.msra.mxu0 %vm41_vm0, %v26_v3  ;;  %206 = vmatpush.msra.mxu3 %v616_v12 }
   0xc   :  { %459 = vmatpush.xpose.msk.msra.mxu1 %vm41_vm0, %v32_v5  ;;  %178 = vmatpush.msra.mxu2 %v632_v43 }
   0xd   :  { %207 = vmatpush.msra.mxu3 %v618_v13 }
   0xe   :  { %456 = vmatmul.msk.f32.vlgmr.msra.gmra.mxu0 %vm41_vm0, %v37_v6 }
   0xf   :  { %460 = vmatmul.msk.f32.vlgmr.msra.gmra.mxu1 %vm41_vm0, %v604_v7  ;;  %258 = vrot.lane.b32.xlu2 %v32_v5, %s582_s13 }
  0x16   :  { %457 = vmatmul.msk.f32.gmra.mxu0 %vm41_vm0, %v611_v10 }
  0x17   :  { %461 = vmatmul.msk.f32.gmra.mxu1 %vm41_vm0, %v40_v11 }
  0x61   :  { %v222_v42 = vpop.permute.xlu2 %221 }
  0x62   :  { %466 = vmatpush.xpose.msk.msrb.mxu2 %vm41_vm0, %v222_v42 }
  0x69   :  { %v259_v46 = vpop.permute.xlu2 %258 }
  0x7a   :  { %v261_v14 = vpop.permute.xlu0 %260 }
  0x7b   :  { %470 = vmatpush.xpose.msk.msrb.mxu3 %vm41_vm0, %v261_v14  ;;  %v485_v14 = vpack.i.bf16 %v616_v12, %v30_v41 }
  0x7f   :  { %471 = vmatpush.xpose.msk.msrb.mxu3 %vm41_vm0, %v259_v46 }
  0x8b   :  { %v71_v15 = vpop.f32.mrf.mxu0 }
  0x8c   :  { %v113_v16 = vsel %vm112_vm1, %v71_v15, -inf  ;;  %v106_v17 = vpop.f32.mrf.mxu1 }
  0x8d   :  { %114 = vmax.xlane.f32.xlu0 %v113_v16  ;;  %v119_v18 = vsel %vm112_vm1, %v106_v17, -inf }
  0x93   :  { %v74_v19 = vpop.f32.mrf.mxu0 }
  0x94   :  { %v116_v20 = vsel %vm112_vm1, %v74_v19, -inf  ;;  %v109_v21 = vpop.f32.mrf.mxu1 }
  0x95   :  { %120 = vmax.xlane.f32.xlu0 %v119_v18  ;;  %117 = vmax.xlane.f32.xlu1 %v116_v20  ;;  %v122_v22 = vsel %vm112_vm1, %v109_v21, -inf }
  0x9d   :  { %123 = vmax.xlane.f32.xlu1 %v122_v22 }
  0xa9   :  { %215 = vrot.lane.b32.xlu0 %v37_v6, %s582_s13 }
  0xb6   :  { %219 = vrot.lane.b32.xlu1 %v26_v3, %s582_s13 }
 0x100   :  { %v115_v23 = vpop.xlane.xlu0 %114 }
 0x101   :  { %v125_v24 = vsub.f32 %v71_v15, %v115_v23 }
 0x103   :  { %v129_v25 = vmul.f32 1.442695, %v125_v24 }
 0x105   :  { %495 = vpow2.f32 %v129_v25 }
 0x108   :  { %v121_v26 = vpop.xlane.xlu0 %120  ;;  %v118_v27 = vpop.xlane.xlu1 %117 }
 0x109   :  { %v127_v28 = vsub.f32 %v106_v17, %v121_v26  ;;  %v126_v29 = vsub.f32 %v74_v19, %v118_v27 }
 0x10b   :  { %v496_v30 = vpop.eup %495  ;;  %v133_v31 = vmul.f32 1.442695, %v127_v28  ;;  %v131_v32 = vmul.f32 1.442695, %v126_v29 }
 0x10c   :  { %v137_v33 = vsel %vm112_vm1, %v496_v30, 0.0 }
 0x10d   :  { %497 = vpow2.f32 %v133_v31  ;;  %138 = vadd.xlane.f32.xlu2 %v137_v33 }
 0x10e   :  { %499 = vpow2.f32 %v131_v32 }
 0x110   :  { %v124_v34 = vpop.xlane.xlu1 %123 }
 0x111   :  { %v128_v35 = vsub.f32 %v109_v21, %v124_v34  ;;  %v490_v34 = vpack.i.bf16 %v618_v13, %v632_v43 }
 0x113   :  { %v498_v36 = vpop.eup %497  ;;  %v135_v37 = vmul.f32 1.442695, %v128_v35 }
 0x114   :  { %v500_v38 = vpop.eup %499  ;;  %v143_v39 = vsel %vm112_vm1, %v498_v36, 0.0 }
 0x115   :  { %501 = vpow2.f32 %v135_v37  ;;  %144 = vadd.xlane.f32.xlu2 %v143_v39  ;;  %v140_v40 = vsel %vm112_vm1, %v500_v38, 0.0 }
 0x116   :  { %141 = vadd.xlane.f32.xlu0 %v140_v40 }
 0x11b   :  { %v502_v44 = vpop.eup %501  ;;  %v216_v49 = vpop.permute.xlu0 %215 }
 0x11c   :  { %v146_v45 = vsel %vm112_vm1, %v502_v44, 0.0 }
 0x11d   :  { %147 = vadd.xlane.f32.xlu1 %v146_v45 }
 0x128   :  { %v220_v47 = vpop.permute.xlu1 %219 }
 0x129   :  { %467 = vmatpush.xpose.msk.msrb.mxu2 %vm41_vm0, %v220_v47 }
 0x12a   :  { %256 = vrot.lane.b32.xlu0 %v40_v11, %s582_s13 }
 0x12d   :  { %254 = vrot.lane.b32.xlu2 %v604_v7, %s582_s13 }
 0x136   :  { %217 = vrot.lane.b32.xlu1 %v611_v10, %s582_s13 }
 0x180   :  { %v139_v48 = vpop.xlane.xlu2 %138 }
 0x181   :  { %503 = vrcp.f32 %v139_v48 }
 0x187   :  { %v504_v50 = vpop.eup %503 }
 0x188   :  { %v145_v51 = vpop.xlane.xlu2 %144  ;;  %v153_v52 = vmul.f32 %v504_v50, %v496_v30 }
 0x189   :  { %505 = vrcp.f32 %v145_v51  ;;  %v142_v53 = vpop.xlane.xlu0 %141 }
 0x18a   :  { %507 = vrcp.f32 %v142_v53  ;;  %462 = vmatmul.msk.f32.vlgmr.msra.gmra.mxu2 %vm112_vm1, %v153_v52 }
 0x18f   :  { %v506_v54 = vpop.eup %505 }
 0x190   :  { %v508_v55 = vpop.eup %507  ;;  %v148_v56 = vpop.xlane.xlu1 %147  ;;  %v155_v57 = vmul.f32 %v506_v54, %v498_v36 }
 0x191   :  { %509 = vrcp.f32 %v148_v56  ;;  %v154_v58 = vmul.f32 %v508_v55, %v500_v38  ;;  %v255_v61 = vpop.permute.xlu2 %254 }
 0x192   :  { %464 = vmatmul.msk.f32.vlgmr.msra.gmra.mxu3 %vm112_vm1, %v155_v57 }
 0x193   :  { %463 = vmatmul.msk.f32.gmra.mxu2 %vm112_vm1, %v154_v58 }
 0x197   :  { %v510_v59 = vpop.eup %509 }
 0x198   :  { %v156_v60 = vmul.f32 %v510_v59, %v502_v44 }
 0x19a   :  { %465 = vmatmul.msk.f32.gmra.mxu3 %vm112_vm1, %v156_v60 }
 0x19b   :  { %468 = vmatmul.msk.f32.vlgmr.msrb.gmra.mxu2 %vm41_vm0, %v216_v49 }
 0x19c   :  { %v257_v62 = vpop.permute.xlu0 %256 }
 0x1a2   :  { %472 = vmatmul.msk.f32.vlgmr.msrb.gmra.mxu3 %vm41_vm0, %v255_v61 }
 0x1a8   :  { %v218_v63 = vpop.permute.xlu1 %217 }
 0x1a9   :  { %469 = vmatmul.msk.f32.gmra.mxu2 %vm41_vm0, %v218_v63 }
 0x1aa   :  { %473 = vmatmul.msk.f32.gmra.mxu3 %vm41_vm0, %v257_v62 }
 0x20d   :  { %v652_v0 = vpop.f32.mrf.mxu2 }
 0x215   :  { %v654_v1 = vpop.f32.mrf.mxu3 }
 0x216   :  { %v656_v2 = vpop.f32.mrf.mxu2 }
 0x21d   :  { %v658_v3 = vpop.f32.mrf.mxu3 }
 0x21e   :  { %v248_v4 = vpop.f32.mrf.mxu2 }
 0x21f   :  { %v293_v5 = vsel %vm112_vm1, %v248_v4, -inf }
 0x220   :  { %294 = vmax.xlane.f32.xlu2 %v293_v5 }
 0x225   :  { %v287_v6 = vpop.f32.mrf.mxu3 }
 0x226   :  { %v299_v7 = vsel %vm112_vm1, %v287_v6, -inf }
 0x227   :  { %300 = vmax.xlane.f32.xlu1 %v299_v7 }
 0x22c   :  { %v251_v8 = vpop.f32.mrf.mxu2 }
 0x22d   :  { %v290_v9 = vpop.f32.mrf.mxu3  ;;  %v296_v10 = vsel %vm112_vm1, %v251_v8, -inf }
 0x22e   :  { %297 = vmax.xlane.f32.xlu0 %v296_v10  ;;  %v302_v11 = vsel %vm112_vm1, %v290_v9, -inf }
 0x22f   :  { %303 = vmax.xlane.f32.xlu2 %v302_v11 }
 0x247   :  { %486 = vrot.lane.b32.xlu2 %v485_v14, %s582_s13 }
 0x293   :  { %v295_v15 = vpop.xlane.xlu2 %294 }
 0x294   :  { %v305_v16 = vsub.f32 %v248_v4, %v295_v15 }
 0x296   :  { %v309_v17 = vmul.f32 1.442695, %v305_v16 }
 0x298   :  { %511 = vpow2.f32 %v309_v17 }
 0x29a   :  { %v301_v18 = vpop.xlane.xlu1 %300 }
 0x29b   :  { %v307_v19 = vsub.f32 %v287_v6, %v301_v18 }
 0x29d   :  { %v313_v20 = vmul.f32 1.442695, %v307_v19 }
 0x29e   :  { %v512_v21 = vpop.eup %511 }
 0x29f   :  { %513 = vpow2.f32 %v313_v20  ;;  %v317_v22 = vsel %vm112_vm1, %v512_v21, 0.0 }
 0x2a0   :  { %318 = vadd.xlane.f32.xlu1 %v317_v22 }
 0x2a1   :  { %v298_v23 = vpop.xlane.xlu0 %297 }
 0x2a2   :  { %v306_v24 = vsub.f32 %v251_v8, %v298_v23  ;;  %v304_v25 = vpop.xlane.xlu2 %303 }
 0x2a3   :  { %v308_v26 = vsub.f32 %v290_v9, %v304_v25 }
 0x2a4   :  { %v311_v27 = vmul.f32 1.442695, %v306_v24 }
 0x2a5   :  { %v514_v12 = vpop.eup %513  ;;  %v315_v28 = vmul.f32 1.442695, %v308_v26 }
 0x2a6   :  { %515 = vpow2.f32 %v311_v27  ;;  %v323_v29 = vsel %vm112_vm1, %v514_v12, 0.0 }
 0x2a7   :  { %517 = vpow2.f32 %v315_v28  ;;  %324 = vadd.xlane.f32.xlu0 %v323_v29 }
 0x2aa   :  { %v487_v35 = vpop.permute.xlu2 %486 }
 0x2ab   :  { %v488_v36 = vunpack.i.l.bf16 %v487_v35  ;;  %v489_v37 = vunpack.i.h.bf16 %v487_v35 }
 0x2ac   :  { %v516_v30 = vpop.eup %515 }
 0x2ad   :  { %v518_v31 = vpop.eup %517  ;;  %v320_v32 = vsel %vm112_vm1, %v516_v30, 0.0  ;;  %365 = vmatpush.msrb.mxu0 %v488_v36  ;;  %402 = vmatpush.msrb.mxu1 %v489_v37 }
 0x2ae   :  { %321 = vadd.xlane.f32.xlu1 %v320_v32  ;;  %v326_v33 = vsel %vm112_vm1, %v518_v31, 0.0 }
 0x2af   :  { %327 = vadd.xlane.f32.xlu0 %v326_v33 }
 0x2c7   :  { %491 = vrot.lane.b32.xlu1 %v490_v34, %s582_s13 }
 0x313   :  { %v319_v38 = vpop.xlane.xlu1 %318 }
 0x314   :  { %519 = vrcp.f32 %v319_v38 }
 0x31a   :  { %v325_v39 = vpop.xlane.xlu0 %324  ;;  %v520_v41 = vpop.eup %519 }
 0x31b   :  { %521 = vrcp.f32 %v325_v39  ;;  %v333_v43 = vmul.f32 %v520_v41, %v512_v21 }
 0x321   :  { %v322_v40 = vpop.xlane.xlu1 %321  ;;  %v522_v44 = vpop.eup %521 }
 0x322   :  { %v328_v42 = vpop.xlane.xlu0 %327  ;;  %523 = vrcp.f32 %v322_v40  ;;  %v335_v47 = vmul.f32 %v522_v44, %v514_v12 }
 0x323   :  { %525 = vrcp.f32 %v328_v42 }
 0x328   :  { %v524_v48 = vpop.eup %523 }
 0x329   :  { %v526_v49 = vpop.eup %525  ;;  %v334_v50 = vmul.f32 %v524_v48, %v516_v30 }
 0x32a   :  { %v336_v51 = vmul.f32 %v526_v49, %v518_v31 }
 0x339   :  { %v492_v45 = vpop.permute.xlu1 %491 }
 0x33a   :  { %v494_v46 = vunpack.i.h.bf16 %v492_v45  ;;  %v493_v13 = vunpack.i.l.bf16 %v492_v45 }
 0x33c   :  { %366 = vmatpush.msrb.mxu0 %v493_v13  ;;  %403 = vmatpush.msrb.mxu1 %v494_v46 }
 0x33d   :  { %474 = vmatmul.msk.f32.vlgmr.msrb.gmra.mxu0 %vm112_vm1, %v333_v43  ;;  %476 = vmatmul.msk.f32.vlgmr.msrb.gmra.mxu1 %vm112_vm1, %v335_v47 }
 0x345   :  { %475 = vmatmul.msk.f32.gmra.mxu0 %vm112_vm1, %v334_v50  ;;  %477 = vmatmul.msk.f32.gmra.mxu1 %vm112_vm1, %v336_v51 }
 0x3ba   :  { %v368_v52 = vpop.f32.mrf.mxu0  ;;  %v405_v53 = vpop.f32.mrf.mxu1 }
 0x3bb   :  { %415 = vrot.lane.b32.xlu0 %v368_v52, %s582_s13 }
 0x3c2   :  { %v371_v54 = vpop.f32.mrf.mxu0  ;;  %v408_v55 = vpop.f32.mrf.mxu1 }
 0x3c3   :  { %421 = vrot.lane.b32.xlu0 %v408_v55, %s582_s13  ;;  %417 = vrot.lane.b32.xlu2 %v371_v54, %s582_s13 }
 0x3cb   :  { %419 = vrot.lane.b32.xlu2 %v405_v53, %s582_s13 }
 0x41d   :  { %v418_v56 = vpop.permute.xlu2 %417 }
 0x41e   :  { %v428_v57 = vsel %vm41_vm0, %v656_v2, %v418_v56 }
 0x41f   :  { %432 = vst [vmem:[#allocation5 + $0x8] sm:$0xff] %v428_v57 }
 0x425   :  { %v420_v58 = vpop.permute.xlu2 %419 }
 0x426   :  { %v429_v59 = vsel %vm41_vm0, %v654_v1, %v420_v58 }
 0x427   :  { %433 = vst [vmem:[#allocation5 + $0x10] sm:$0xff] %v429_v59 }
 0x42d   :  { %v416_v60 = vpop.permute.xlu0 %415 }
 0x42e   :  { %v427_v61 = vsel %vm41_vm0, %v652_v0, %v416_v60 }
 0x42f   :  { %431 = vst [vmem:[#allocation5] sm:$0xff] %v427_v61 }
 0x435   :  { %v422_v62 = vpop.permute.xlu0 %421 }
 0x436   :  { %v430_v63 = vsel %vm41_vm0, %v658_v3, %v422_v62 }
 0x437   :  { %434 = vst [vmem:[#allocation5 + $0x18] sm:$0xff] %v430_v63 }
 0x438   :  { %447 = dma.vmem_to_hbm [thread:$0]  %s440_s14, 512, %s442_s17, [#allocation4], %s584_s18, %s584_s18, %s585_s19  }
 0x439   :  { %577 = dma.done.wait [#allocation4], 512  }
 0x43a   :  { %578 = vsyncadd [#allocation4], 4294966784 }
 0x43b   :  { %452 = vsyncpa [#allocation3], 1 }
 0x43c   :  { %453 = vsyncpa [#allocation4], 1 }

</bundles_post_ra>
